<compile_context>
chip_gen: v5e
topology: v5e:2x2
jax: 0.10.0
libtpu: 0.0.40
codegen_flags: <defaults>
</compile_context>

<pallas_src>
import functools

import jax
import jax.numpy as jnp
from jax.experimental import pallas as pl
from jax.experimental.pallas import tpu as pltpu


# ---------------------------------------------------------------------------
# VMEM / tiling policy
# ---------------------------------------------------------------------------

def _round_up(x, m):
    return ((x + m - 1) // m) * m


def _vmem_limit_bytes():
    """Generation-aware vmem limit: 96 MiB on 128-MiB chips (v5e/v6e),
    48 MiB on 64-MiB chips (v7x).  Falls back to the safe 48 MiB."""
    cap = None
    try:
        info = pltpu.get_tpu_info()
        cap = getattr(info, "vmem_capacity_bytes", None)
    except Exception:
        cap = None
    if cap is not None and cap >= (100 << 20):
        return 96 << 20
    return 48 << 20


def _tile_budget_bytes(vmem_limit, weight_bytes):
    # 4x tile (double-buffered input + output), single-buffered weights,
    # ~4 MiB headroom for Mosaic internal scratch / small temporaries.
    return max(1 << 20, (vmem_limit - weight_bytes - (4 << 20)) // 4)


def _choose_block_batch(B, C, L_pad, itemsize, tile_budget_bytes):
    """Largest divisor Bb of B whose (Bb, C, L_pad) tile fits the budget.
    Prefers an even number of grid steps (v7x dual-TC split) and, for large
    problems, >= 4 steps with >= ~4 MiB tiles so the pipeline overlaps.
    Returns None when even Bb=1 does not fit (caller uses two-pass path)."""
    per_batch = C * L_pad * itemsize
    fits = [d for d in range(1, B + 1)
            if B % d == 0 and d * per_batch <= tile_budget_bytes]
    if not fits:
        return None

    total_bytes = B * per_batch
    even = [d for d in fits if (B // d) % 2 == 0]

    if total_bytes >= (32 << 20):
        tiers = (
            [d for d in even if B // d >= 4 and d * per_batch >= (4 << 20)],
            [d for d in even if B // d >= 4],
            [d for d in even if B // d >= 2],
            [d for d in fits if B // d >= 2],
        )
    else:
        tiers = (
            [d for d in even if B // d >= 2],
            [d for d in fits if B // d >= 2],
        )
    for cands in tiers:
        if cands:
            return max(cands)
    return max(fits)


def _choose_length_chunk(C, L_pad, itemsize, tile_budget_bytes):
    """Largest multiple of 128 dividing L_pad with (1, C, Lc) within budget."""
    # TODO(synk): if even (1, C, 128) exceeds the budget (extremely large C),
    # the channel axis would also need tiling; not needed for SE-layer sizes.
    max_lc = max(128, (tile_budget_bytes // max(1, C * itemsize)) // 128 * 128)
    best = 128
    lc = 128
    while lc <= L_pad:
        if L_pad % lc == 0 and lc <= max_lc:
            best = lc
        lc += 128
    return best


# ---------------------------------------------------------------------------
# Kernels
# ---------------------------------------------------------------------------

def _se_single_pass_kernel(x_ref, w1t_ref, w2t_ref, o_ref, *, inv_L):
    # x_ref: (Bb, C, L_pad); w1t_ref: (C, C_red); w2t_ref: (C_red, C)
    # squeeze: lane-axis sum in f32, true-L mean; the (Bb,C,L) value does not
    # survive past this reduce (no big live range across the excitation).
    y = jnp.sum(x_ref[...], axis=-1, dtype=jnp.float32) * jnp.float32(inv_L)   # (Bb, C)
    # excitation: small batched matmuls on the MXU, hidden under the DMA stream.
    h = jnp.maximum(jnp.dot(y, w1t_ref[...], preferred_element_type=jnp.float32), 0.0)
    s = jax.nn.sigmoid(jnp.dot(h, w2t_ref[...], preferred_element_type=jnp.float32))
    # scale: re-read the VMEM-resident tile; multiply in the input dtype.
    o_ref[...] = x_ref[...] * s.astype(o_ref.dtype)[:, :, None]


def _se_sum_kernel(x_ref, s_ref):
    # x_ref: (1, C, Lc); s_ref: (1, C, 1) f32 accumulator resident across L chunks.
    @pl.when(pl.program_id(1) == 0)
    def _():
        s_ref[...] = jnp.zeros_like(s_ref)
    s_ref[...] += jnp.sum(x_ref[...], axis=-1, keepdims=True, dtype=jnp.float32)


def _se_scale_kernel(x_ref, g_ref, o_ref):
    # x_ref: (1, C, Lc); g_ref: (1, C, 1) gate; broadcast multiply over lanes.
    o_ref[...] = x_ref[...] * g_ref[...].astype(o_ref.dtype)


# ---------------------------------------------------------------------------
# Wrappers
# ---------------------------------------------------------------------------

def _se_layer_single_pass(x_p, w1t, w2t, L_orig, Bb, vmem_limit):
    B, C, L_pad = x_p.shape
    C_red = w1t.shape[1]
    itemsize = x_p.dtype.itemsize
    weight_bytes = (w1t.size * w1t.dtype.itemsize) + (w2t.size * w2t.dtype.itemsize)

    kernel = functools.partial(_se_single_pass_kernel, inv_L=1.0 / float(L_orig))

    return pl.pallas_call(
        kernel,
        out_shape=jax.ShapeDtypeStruct((B, C, L_pad), x_p.dtype),
        grid_spec=pltpu.PrefetchScalarGridSpec(
            num_scalar_prefetch=0,
            grid=(B // Bb,),
            in_specs=[
                pl.BlockSpec((Bb, C, L_pad), lambda b: (b, 0, 0)),
                # resident weights; block index never changes -> single buffer
                pl.BlockSpec((C, C_red), lambda b: (0, 0),
                             pipeline_mode=pl.Buffered(1)),
                pl.BlockSpec((C_red, C), lambda b: (0, 0),
                             pipeline_mode=pl.Buffered(1)),
            ],
            out_specs=pl.BlockSpec((Bb, C, L_pad), lambda b: (b, 0, 0)),
        ),
        compiler_params=pltpu.CompilerParams(
            dimension_semantics=("parallel",),
            vmem_limit_bytes=vmem_limit,
        ),
        cost_estimate=pl.CostEstimate(
            flops=2 * B * C * L_pad + 4 * B * C * C_red,
            transcendentals=B * C,
            bytes_accessed=2 * B * C * L_pad * itemsize + weight_bytes,
        ),
    )(x_p, w1t, w2t)


def _se_layer_two_pass(x_p, w1t, w2t, L_orig, tile_budget, vmem_limit):
    """Fallback when a (1, C, L_pad) tile exceeds the VMEM budget:
    pass 1 accumulates per-channel sums over L chunks, the tiny excitation
    runs in plain JAX, pass 2 streams x * gate."""
    B, C, L_pad = x_p.shape
    itemsize = x_p.dtype.itemsize
    Lc = _choose_length_chunk(C, L_pad, itemsize, tile_budget)
    n_lc = L_pad // Lc

    sums = pl.pallas_call(
        _se_sum_kernel,
        out_shape=jax.ShapeDtypeStruct((B, C, 1), jnp.float32),
        grid_spec=pltpu.PrefetchScalarGridSpec(
            num_scalar_prefetch=0,
            grid=(B, n_lc),
            in_specs=[pl.BlockSpec((1, C, Lc), lambda b, l: (b, 0, l))],
            out_specs=pl.BlockSpec((1, C, 1), lambda b, l: (b, 0, 0)),
        ),
        compiler_params=pltpu.CompilerParams(
            dimension_semantics=("parallel", "arbitrary"),
            vmem_limit_bytes=vmem_limit,
        ),
        cost_estimate=pl.CostEstimate(
            flops=B * C * L_pad,
            transcendentals=0,
            bytes_accessed=B * C * L_pad * itemsize + B * C * 4,
        ),
    )(x_p)

    # Tiny excitation in plain JAX (O(B*C^2/r) flops: negligible next to streaming).
    y = sums[:, :, 0] * jnp.float32(1.0 / float(L_orig))          # (B, C) true mean
    h = jnp.maximum(jnp.dot(y, w1t), 0.0)                         # (B, C_red)
    gate = jax.nn.sigmoid(jnp.dot(h, w2t)).astype(jnp.float32)    # (B, C)
    gate = gate[:, :, None]                                       # (B, C, 1)

    return pl.pallas_call(
        _se_scale_kernel,
        out_shape=jax.ShapeDtypeStruct((B, C, L_pad), x_p.dtype),
        grid_spec=pltpu.PrefetchScalarGridSpec(
            num_scalar_prefetch=0,
            grid=(B, n_lc),
            in_specs=[
                pl.BlockSpec((1, C, Lc), lambda b, l: (b, 0, l)),
                pl.BlockSpec((1, C, 1), lambda b, l: (b, 0, 0)),
            ],
            out_specs=pl.BlockSpec((1, C, Lc), lambda b, l: (b, 0, l)),
        ),
        compiler_params=pltpu.CompilerParams(
            dimension_semantics=("parallel", "parallel"),
            vmem_limit_bytes=vmem_limit,
        ),
        cost_estimate=pl.CostEstimate(
            flops=B * C * L_pad,
            transcendentals=0,
            bytes_accessed=2 * B * C * L_pad * itemsize + B * C * 4,
        ),
    )(x_p, gate)


def se_layer(x, w1, w2):
    """x: (B, C, L); w1: (C//r, C); w2: (C, C//r) (PyTorch nn.Linear weights)."""
    B, C, L = x.shape

    # Transpose the weights once here (never per grid step inside the kernel).
    w1t = jnp.transpose(w1)          # (C, C_red)
    w2t = jnp.transpose(w2)          # (C_red, C)

    itemsize = x.dtype.itemsize
    # Lane-dense output: pad L to a multiple of 128; the kernels divide by the
    # true L so zero padding does not change the mean; slice the result back.
    L_pad = _round_up(L, 128)
    x_p = jnp.pad(x, ((0, 0), (0, 0), (0, L_pad - L))) if L_pad != L else x

    vmem_limit = _vmem_limit_bytes()
    weight_bytes = (w1t.size * w1t.dtype.itemsize) + (w2t.size * w2t.dtype.itemsize)
    tile_budget = _tile_budget_bytes(vmem_limit, weight_bytes)

    Bb = _choose_block_batch(B, C, L_pad, itemsize, tile_budget)
    if Bb is None:
        out_p = _se_layer_two_pass(x_p, w1t, w2t, L, tile_budget, vmem_limit)
    else:
        out_p = _se_layer_single_pass(x_p, w1t, w2t, L, Bb, vmem_limit)

    return out_p[:, :, :L] if L_pad != L else out_p


def se_layer_ref(x, w1, w2):
    # pure-JAX reference of the PyTorch forward
    y = jnp.mean(x, axis=-1)                       # (B, C)
    h = jnp.maximum(y @ w1.T, 0.0)                 # (B, C_red)
    s = jax.nn.sigmoid(h @ w2.T)                   # (B, C)
    return x * s[:, :, None]


if __name__ == "__main__":
    B, C, L = 2, 64, 128
    reduction = 16
    C_red = C // reduction

    key = jax.random.PRNGKey(0)
    kx, k1, k2, kx2 = jax.random.split(key, 4)

    x = jax.random.normal(kx, (B, C, L), dtype=jnp.float32)
    # deterministic synthetic weights, shaped like nn.Linear(C, C//r) / nn.Linear(C//r, C)
    w1 = jax.random.normal(k1, (C_red, C), dtype=jnp.float32) * 0.1
    w2 = jax.random.normal(k2, (C, C_red), dtype=jnp.float32) * 0.1

    # --- main (single-pass) path ---
    out = jax.block_until_ready(se_layer(x, w1, w2))
    ref = se_layer_ref(x, w1, w2)
    assert out.shape == (B, C, L)
    assert jnp.allclose(out, ref, atol=1e-5, rtol=1e-5)

    # --- exercise the two-pass fallback explicitly (tiny budget forces L chunks) ---
    L2 = 256
    x2 = jax.random.normal(kx2, (B, C, L2), dtype=jnp.float32)
    out2 = jax.block_until_ready(
        _se_layer_two_pass(
            x2, jnp.transpose(w1), jnp.transpose(w2), L2,
            tile_budget=C * 128 * x2.dtype.itemsize, vmem_limit=48 << 20))
    ref2 = se_layer_ref(x2, w1, w2)
    assert out2.shape == (B, C, L2)
    assert jnp.allclose(out2, ref2, atol=1e-5, rtol=1e-5)

    print("KERNEL_OK")
</pallas_src>

<mosaic_0001>
module attributes {stable_mosaic.version = 11 : i64} {
  func.func @_se_single_pass_kernel(%arg0: i32, %arg1: memref<1x64x128xf32, #tpu.memory_space<vmem>>, %arg2: memref<64x4xf32, #tpu.memory_space<vmem>>, %arg3: memref<4x64xf32, #tpu.memory_space<vmem>>, %arg4: memref<1x64x128xf32, #tpu.memory_space<vmem>>) attributes {dimension_semantics = [#tpu.dimension_semantics<parallel>], iteration_bounds = array<i64: 2>, scalar_prefetch = 0 : i64, scratch_operands = 0 : i64, tpu.core_type = #tpu.core_type<tc>, window_params = [{transform_indices = @transform_0, window_bounds = array<i64: 1, 64, 128>}, {pipeline_mode = #tpu.pipeline_mode<synchronous>, transform_indices = @transform_1, window_bounds = array<i64: 64, 4>}, {pipeline_mode = #tpu.pipeline_mode<synchronous>, transform_indices = @transform_2, window_bounds = array<i64: 4, 64>}, {transform_indices = @transform_3, window_bounds = array<i64: 1, 64, 128>}]} {
    %c0 = arith.constant 0 : index
    %c0_0 = arith.constant 0 : index
    %c0_1 = arith.constant 0 : index
    %0 = vector.load %arg1[%c0, %c0_0, %c0_1] : memref<1x64x128xf32, #tpu.memory_space<vmem>>, vector<1x64x128xf32>
    %cst = arith.constant dense<0.000000e+00> : vector<1x64xf32>
    %1 = vector.multi_reduction <add>, %0, %cst [2] : vector<1x64x128xf32> to vector<1x64xf32>
    %cst_2 = arith.constant 7.812500e-03 : f32
    %2 = vector.broadcast %cst_2 : f32 to vector<1x64xf32>
    %3 = arith.mulf %1, %2 : vector<1x64xf32>
    %c0_3 = arith.constant 0 : index
    %c0_4 = arith.constant 0 : index
    %4 = vector.load %arg2[%c0_3, %c0_4] : memref<64x4xf32, #tpu.memory_space<vmem>>, vector<64x4xf32>
    %cst_5 = arith.constant dense<0.000000e+00> : vector<1x4xf32>
    %5 = tpu.matmul %3, %4, %cst_5 {dimension_numbers = #tpu.dot_dimension_numbers<[1], [0], [0], [1], [0, 0, 1, 1], [], []>} : vector<1x64xf32>, vector<64x4xf32>, vector<1x4xf32> -> vector<1x4xf32>
    %cst_6 = arith.constant 0.000000e+00 : f32
    %6 = vector.broadcast %cst_6 : f32 to vector<1x4xf32>
    %7 = arith.maximumf %5, %6 : vector<1x4xf32>
    %c0_7 = arith.constant 0 : index
    %c0_8 = arith.constant 0 : index
    %8 = vector.load %arg3[%c0_7, %c0_8] : memref<4x64xf32, #tpu.memory_space<vmem>>, vector<4x64xf32>
    %cst_9 = arith.constant dense<0.000000e+00> : vector<1x64xf32>
    %9 = tpu.matmul %7, %8, %cst_9 {dimension_numbers = #tpu.dot_dimension_numbers<[1], [0], [0], [1], [0, 0, 1, 1], [], []>} : vector<1x4xf32>, vector<4x64xf32>, vector<1x64xf32> -> vector<1x64xf32>
    %10 = arith.negf %9 : vector<1x64xf32>
    %11 = math.exp %10 : vector<1x64xf32>
    %cst_10 = arith.constant 1.000000e+00 : f32
    %12 = vector.broadcast %cst_10 : f32 to vector<1x64xf32>
    %13 = arith.addf %12, %11 : vector<1x64xf32>
    %14 = arith.divf %12, %13 : vector<1x64xf32>
    %c0_11 = arith.constant 0 : index
    %c0_12 = arith.constant 0 : index
    %c0_13 = arith.constant 0 : index
    %15 = vector.load %arg1[%c0_11, %c0_12, %c0_13] : memref<1x64x128xf32, #tpu.memory_space<vmem>>, vector<1x64x128xf32>
    %16 = vector.shape_cast %14 : vector<1x64xf32> to vector<1x64x1xf32>
    %17 = vector.broadcast %16 : vector<1x64x1xf32> to vector<1x64x128xf32>
    %18 = arith.mulf %15, %17 : vector<1x64x128xf32>
    %c0_14 = arith.constant 0 : index
    %c0_15 = arith.constant 0 : index
    %c0_16 = arith.constant 0 : index
    %19 = vector.load %arg4[%c0_14, %c0_15, %c0_16] : memref<1x64x128xf32, #tpu.memory_space<vmem>>, vector<1x64x128xf32>
    tpu.vector_store %arg4[%c0_14, %c0_15, %c0_16], %18 {strides = array<i32>} : memref<1x64x128xf32, #tpu.memory_space<vmem>>, vector<1x64x128xf32>,
    return
  }
  func.func @transform_0(%arg0: i32) -> (i32, i32, i32) {
    %c0_i32 = arith.constant 0 : i32
    %c0_i32_0 = arith.constant 0 : i32
    %c0_i32_1 = arith.constant 0 : i32
    return %arg0, %c0_i32, %c0_i32_0 : i32, i32, i32
  }
  func.func @transform_1(%arg0: i32) -> (i32, i32) {
    %c0_i32 = arith.constant 0 : i32
    %c0_i32_0 = arith.constant 0 : i32
    %c0_i32_1 = arith.constant 0 : i32
    return %c0_i32, %c0_i32_0 : i32, i32
  }
  func.func @transform_2(%arg0: i32) -> (i32, i32) {
    %c0_i32 = arith.constant 0 : i32
    %c0_i32_0 = arith.constant 0 : i32
    %c0_i32_1 = arith.constant 0 : i32
    return %c0_i32, %c0_i32_0 : i32, i32
  }
  func.func @transform_3(%arg0: i32) -> (i32, i32, i32) {
    %c0_i32 = arith.constant 0 : i32
    %c0_i32_0 = arith.constant 0 : i32
    %c0_i32_1 = arith.constant 0 : i32
    return %arg0, %c0_i32, %c0_i32_0 : i32, i32, i32
  }
}

</mosaic_0001>

<bundles_post_ra>
// kernel: tpu_custom_call.1
= control target key start
LH: loop header
LB: loop body
LE: loop exit
PB: predicated region body
PF: predicated region fallthrough
CT: control target
= control target key end

     0   :  { %8 = vsyncpa [#allocation3], 0  ;;  %s891_s0 = inlined_call_operand.hbm [shape: f32[2,64,128], index: 0, kind: input, shape index: {}]   ;;  %s892_s1 = inlined_call_operand.vmem [shape: f32[64,4], index: 1, kind: input, shape index: {}]   ;;  %s893_s2 = inlined_call_operand.vmem [shape: f32[4,64], index: 2, kind: input, shape index: {}]   ;;  %s894_s3 = inlined_call_operand.hbm [shape: f32[2,64,128], index: 3, kind: output, shape index: {}]  }
   0x1   :  { %10 = vsyncpa [#allocation3 + $0x1], 0 }
   0x2   :  { %11 = vsyncpa [#allocation4], 0 }
   0x3   :  { %13 = vsyncpa [#allocation4 + $0x1], 0  ;;  %s701_s12 = smov 0   ;;  %s703_s13 = smov 0  }
   0x4   :  { %s705_s14 = smov 0   ;;  %s707_s15 = smov 0  }
   0x5 LB: > { %s722_s16 = sadd.s32 4294967295, %s675_s15   ;;  %s496_s17 = sadd.s32 4294967294, %s675_s15   ;;  %s675_s15 = sphi %s707_s15, %s904_s15   ;;  %s671_s14 = sphi %s705_s14, %s903_s14   ;;  %s667_s13 = sphi %s703_s13, %s902_s13   ;;  %s663_s12 = sphi %s701_s12, %s901_s12  }
   0x6   : > { %s726_s18 = sadd.s32 1, %s675_s15   ;;  %s26_s19 = sadd.s32 1, %s671_s14 }
   0x7   : > { %s23_s20 = ssub.s32 %s675_s15, %s726_s18  ;;  %p33_p0 = scmp.ne.s32.totalorder %s671_s14, %s667_s13 }
   0x8   : > { %p24_p1 = scmp.eq.s32.totalorder %s23_s20, 0  ;;  %p34_p2 = scmp.eq.s32.totalorder %s675_s15, 0 }
   0x9   : > { %p39_p3 = scmp.ne.s32.totalorder %s667_s13, %s663_s12  ;;  %p40_p4 = scmp.eq.s32.totalorder %s722_s16, 0 }
   0xa   : > { %s738_s21 = scalar_select %p24_p1, %s671_s14, %s26_s19  }
   0xb   : > { %p740_p5 = por %p34_p2, %p33_p0  ;;  %p744_p6 = por %p40_p4, %p39_p3 }
   0xc   : > { %p105_p7 = scmp.eq.s32.totalorder %s722_s16, 1  ;;  %p111_p8 = scmp.eq.s32.totalorder %s496_s17, 1 }
   0xd   : > { %p528_p10 = scmp.lt.s32.totalorder %s675_s15, 2  ;;  %s137_s26 = sand.u32 1, %s671_s14  }
   0xe   : > { %p751_p11 = por %p105_p7, %p33_p0  ;;  %p755_p12 = por %p111_p8, %p39_p3 }
   0xf   : > { %s514_s27 = sshll.u32 %s675_s15, 6  ;;  %s499_s28 = sshll.u32 %s137_s26, 6 }
  0x10   : > { %s146_s4 = scalar_lea.hbm %s891_s0, %s514_s27  ;;  %s141_s6 = scalar_lea.vmem [#allocation2], %s499_s28 }
  0x11   : > { %s147_s5 = sshll.u32 %s146_s4, 4  ;;  %s149_s7 = sshll.u32 %s141_s6, 4  ;;  %s148_s5 = int_to_ptr.hbm [resolvable:$true] %s147_s5  ;;  %s150_s7 = int_to_ptr.vmem [resolvable:$true] %s149_s7 }
  0x12   : > { %p766_p13 = pnand %p528_p10, %p740_p5  ;;  %p502_p0 = scmp.ge.s32.totalorder %s675_s15, 1 }
  0x13   : > { %p157_p1 = scmp.lt.s32.totalorder %s675_s15, 3  ;;  %s138_s9 = scalar_lea.sflag [#allocation3], %s137_s26 }
  0x14   : > { %s579_s10 = sshra.s32 %s148_s5, 4  ;;  %p583_p3 = pneg %p766_p13  ;;  %s580_s10 = int_to_ptr.hbm [resolvable:$true] %s579_s10 }
  0x15   : > { %s581_s11 = scalar_lea.hbm %s580_s10, 64  ;;  %s586_s20 = scalar_lea.hbm %s891_s0, 128 }
  0x16   : > { %p582_p2 = scmp.ne.s32.totalorder %s580_s10, %s581_s11  ;;  %p587_p5 = scmp.lt.s32.totalorder %s580_s10, %s891_s0 }
  0x17   : > { %p588_p8 = scmp.lt.s32.totalorder %s586_s20, %s581_s11 }
  0x18   : > { %p584_p4 = pnand %p583_p3, %p582_p2 }
  0x19   : > { %p589_p10 = por %p588_p8, %p587_p5 }
  0x1a   : > { %p585_p7 = pneg %p584_p4 }
  0x1c   : > { %p590_p9 = pnand %p589_p10, %p585_p7 }
  0x1e   : > { %593 = shalt.err (!%p590_p9)
}
  0x1f   : > { %s677_s26 = smov 128   ;;  %s678_s28 = smov 8  }
  0x20   : > { %523 = dma.hbm_to_vmem [thread:$0]  (!%p766_p13), %s148_s5, 1024, %s150_s7, %s138_s9, %s677_s26, %s677_s26, %s678_s28  }
  0x21   : > { %p158_p2 = pnand %p502_p0, %p157_p1 }
  0x22   : > { %s787_s29 = sand.u32 (!%p158_p2), 1, %s667_s13  }
  0x23   : > { %161 = sbr.rel (%p158_p2) target bundleno = 617 (0x269), region = 32  ;;  %s503_s30 = sshll.u32 (!%p158_p2), %s787_s29, 6 }
  0x24   : > { %s164_s4 = scalar_lea.sflag (!%p158_p2), [#allocation3], %s787_s29  ;;  %s167_s6 = scalar_lea.vmem (!%p158_p2), [#allocation2], %s503_s30 }
  0x28   : > { %654 = dma.done.wait (%p744_p6), %s164_s4, 1024  }
  0x29   : > { %656 = vsyncadd (%p744_p6), %s164_s4, 4294966272  ;;  %v797_v0 = vld [vmem:[%s167_s6] sm:$0xff]  ;;  %v799_v1 = vld [vmem:[%s167_s6 + $0x10] sm:$0xff]  ;;  %v239_v16 = vlaneseq  ;;  %vm244_vm0 = vcmask 130112   ;;  %vm248_vm1 = vcmask 195712   ;;  %vm252_vm2 = vcmask 261312  }
  0x2a   : > { %v801_v2 = vld [vmem:[%s167_s6 + $0x20] sm:$0xff]  ;;  %199 = vadd.xlane.f32.xlu0 %v797_v0  ;;  %203 = vadd.xlane.f32.xlu1 %v799_v1  ;;  %v806_v3 = vld [vmem:[%s167_s6 + $0x8] sm:$0xff]  ;;  %v808_v4 = vld [vmem:[%s167_s6 + $0x18] sm:$0xff]  ;;  %vm256_vm3 = vcmask 326912   ;;  %vm260_vm4 = vcmask 392512   ;;  %vm264_vm5 = vcmask 458112  }
  0x2b   : > { %207 = vadd.xlane.f32.xlu2 %v801_v2  ;;  %v810_v5 = vld [vmem:[%s167_s6 + $0x28] sm:$0xff]  ;;  %v815_v6 = vld [vmem:[%s167_s6 + $0x30] sm:$0xff]  ;;  %v817_v7 = vld [vmem:[%s167_s6 + $0x38] sm:$0xff]  ;;  %v240_v20 = vand.u32 127, %v239_v16  ;;  %vm268_vm6 = vcmask 523712   ;;  %vm270_vm7 = vcmask 523264  }
  0x2c   : > { %v230_v8 = vld [vmem:[%s892_s1 + $0x38] sm:$0xff]  ;;  %v229_v9 = vld [vmem:[%s892_s1 + $0x30] sm:$0xff]  ;;  %v228_v10 = vld [vmem:[%s892_s1 + $0x28] sm:$0xff]  ;;  %vm299_vm8 = vcmask 1043456   ;;  %vm295_vm9 = vcmask 31744   ;;  %v344_v59 = vshrl.u32 %v239_v16, 7 }
  0x2d   : > { %281 = vmatpush.msra.mxu0 %v230_v8  ;;  %v227_v11 = vld [vmem:[%s892_s1 + $0x20] sm:$0xff]  ;;  %v226_v12 = vld [vmem:[%s892_s1 + $0x18] sm:$0xff]  ;;  %v225_v13 = vld [vmem:[%s892_s1 + $0x10] sm:$0xff]  ;;  %v242_v22 = vadd.s32 4294967288, %v240_v20  ;;  %v250_v23 = vadd.s32 4294967272, %v240_v20  ;;  %v246_v24 = vadd.s32 4294967280, %v240_v20 }
  0x2e   : > { %v224_v14 = vld [vmem:[%s892_s1 + $0x8] sm:$0xff]  ;;  %v223_v15 = vld [vmem:[%s892_s1] sm:$0xff]  ;;  %v254_v31 = vadd.s32 4294967264, %v240_v20  ;;  %v258_v37 = vadd.s32 4294967256, %v240_v20  ;;  %v262_v43 = vadd.s32 4294967248, %v240_v20  ;;  %v266_v44 = vadd.s32 4294967240, %v240_v20  ;;  %566 = vset.pattern.permute.xlu2 %v344_v59 }
  0x2f   : > { %282 = vmatpush.msra.mxu0 %v229_v9  ;;  %v294_v56 = vld [vmem:[%s893_s2] sm:$0xf]  ;;  %v357_v60 = vadd.s32 16, %v344_v59  ;;  %v351_v61 = vadd.s32 8, %v344_v59  ;;  %s190_s7 = scalar_lea.vmem [#allocation5], %s503_s30  ;;  %s515_s30 = sshll.u32 %s722_s16, 6 }
  0x30   : > { %506 = vmatpush.msk.msra.mxu1 %vm299_vm8, %v294_v56  ;;  %s419_s10 = scalar_lea.hbm %s894_s3, %s515_s30  ;;  %s420_s11 = sshll.u32 %s190_s7, 4  ;;  %s421_s11 = int_to_ptr.vmem [resolvable:$true] %s420_s11 }
  0x31   : > { %283 = vmatpush.msra.mxu0 %v228_v10  ;;  %568 = vset.pattern.permute.xlu1 %v357_v60  ;;  %s422_s17 = sshll.u32 %s419_s10, 4  ;;  %s408_s19 = scalar_lea.sflag [#allocation4], %s787_s29  ;;  %s423_s17 = int_to_ptr.hbm [resolvable:$true] %s422_s17 }
  0x32   : > { %201 = vadd.xlane.f32.xlu0 %v806_v3  ;;  %205 = vadd.xlane.f32.xlu1 %v808_v4  ;;  %s623_s20 = sshra.s32 %s423_s17, 4  ;;  %s629_s26 = scalar_lea.hbm %s894_s3, 128  ;;  %s624_s20 = int_to_ptr.hbm [resolvable:$true] %s623_s20 }
  0x33   : > { %209 = vadd.xlane.f32.xlu2 %v810_v5  ;;  %284 = vmatpush.msra.mxu0 %v227_v11  ;;  %s625_s16 = scalar_lea.hbm %s624_s20, 64  ;;  %p630_p0 = scmp.lt.s32.totalorder %s624_s20, %s894_s3 }
  0x34   : > { %567 = vset.pattern.permute.xlu0 %v351_v61  ;;  %p626_p6 = scmp.ne.s32.totalorder %s624_s20, %s625_s16  ;;  %p631_p1 = scmp.lt.s32.totalorder %s629_s26, %s625_s16 }
  0x35   : > { %285 = vmatpush.msra.mxu0 %v226_v12 }
  0x36   : > { %p627_p9 = pnand %p626_p6, %p751_p11  ;;  %p632_p3 = por %p631_p1, %p630_p0 }
  0x37   : > { %286 = vmatpush.msra.mxu0 %v225_v13 }
  0x38   : > { %p628_p13 = pneg %p627_p9 }
  0x39   : > { %287 = vmatpush.msra.mxu0 %v224_v14 }
  0x3a   : > { %211 = vadd.xlane.f32.xlu0 %v815_v6  ;;  %213 = vadd.xlane.f32.xlu1 %v817_v7  ;;  %p633_p4 = pnand %p632_p3, %p628_p13 }
  0x3b   : > { %288 = vmatpush.msra.mxu0 %v223_v15 }
  0x9d   : > { %v200_v17 = vpop.xlane.xlu0 %199  ;;  %v204_v18 = vpop.xlane.xlu1 %203 }
  0x9e   : > { %v208_v19 = vpop.xlane.xlu2 %207  ;;  %v215_v21 = vmul.f32 0.0078125, %v200_v17  ;;  %v217_v25 = vmul.f32 0.0078125, %v204_v18 }
  0x9f   : > { %v219_v33 = vmul.f32 0.0078125, %v208_v19 }
  0xa0   : > { %v241_v32 = vperm.slane %v215_v21, %v240_v20  ;;  %v247_v36 = vperm.slane %v217_v25, %v246_v24  ;;  %v375_v21 = vadd.s32 40, %v344_v59  ;;  %v369_v24 = vadd.s32 32, %v344_v59 }
  0xa1   : > { %v255_v41 = vperm.slane %v219_v33, %v254_v31  ;;  %v381_v25 = vadd.s32 48, %v344_v59 }
  0xa5   : > { %v202_v26 = vpop.xlane.xlu0 %201  ;;  %v206_v27 = vpop.xlane.xlu1 %205 }
  0xa6   : > { %v216_v28 = vmul.f32 0.0078125, %v202_v26  ;;  %v218_v29 = vmul.f32 0.0078125, %v206_v27  ;;  %v210_v30 = vpop.xlane.xlu2 %209 }
  0xa7   : > { %v220_v38 = vmul.f32 0.0078125, %v210_v30 }
  0xa8   : > { %v243_v34 = vperm.slane %v216_v28, %v242_v22  ;;  %v251_v35 = vperm.slane %v218_v29, %v250_v23  ;;  %v363_v22 = vadd.s32 24, %v344_v59  ;;  %v387_v23 = vadd.s32 56, %v344_v59 }
  0xa9   : > { %v259_v45 = vperm.slane %v220_v38, %v258_v37 }
  0xaa   : > { %v245_v39 = vsel %vm244_vm0, %v243_v34, %v241_v32 }
  0xab   : > { %v249_v40 = vsel %vm248_vm1, %v247_v36, %v245_v39 }
  0xac   : > { %v253_v42 = vsel %vm252_vm2, %v251_v35, %v249_v40 }
  0xad   : > { %v212_v46 = vpop.xlane.xlu0 %211  ;;  %v214_v47 = vpop.xlane.xlu1 %213  ;;  %v257_v50 = vsel %vm256_vm3, %v255_v41, %v253_v42 }
  0xae   : > { %v221_v48 = vmul.f32 0.0078125, %v212_v46  ;;  %v222_v49 = vmul.f32 0.0078125, %v214_v47  ;;  %v261_v53 = vsel %vm260_vm4, %v259_v45, %v257_v50 }
  0xb0   : > { %v263_v51 = vperm.slane %v221_v48, %v262_v43  ;;  %v267_v52 = vperm.slane %v222_v49, %v266_v44 }
  0xb2   : > { %v265_v54 = vsel %vm264_vm5, %v263_v51, %v261_v53 }
  0xb3   : > { %v269_v55 = vsel %vm268_vm6, %v267_v52, %v265_v54 }
  0xb4   : > { %505 = vmatmul.msk.f32.vlgmr.msra.gmra.mxu0 %vm270_vm7, %v269_v55 }
 0x131   : > { %v290_v57 = vpop.f32.mrf.mxu0 }
 0x132   : > { %v293_v58 = vmax.f32 %v290_v57, 0.0 }
 0x134   : > { %507 = vmatmul.msk.f32.vlgmr.msra.gmra.mxu1 %vm295_vm9, %v293_v58 }
 0x1b1   : > { %v320_v62 = vpop.f32.mrf.mxu1 }
 0x1b2   : > { %v508_v63 = vmul.f32 -1.442695, %v320_v62 }
 0x1b4   : > { %575 = vpow2.f32 %v508_v63 }
 0x1ba   : > { %v576_v8 = vpop.eup %575 }
 0x1bb   : > { %v326_v9 = vadd.f32 1.0, %v576_v8 }
 0x1bd   : > { %577 = vrcp.f32 %v326_v9  ;;  %v338_v13 = vand.u32 2147483648, %v326_v9  ;;  %v336_v15 = vand.u32 2147483647, %v326_v9  ;;  %vm332_vm11 = vweird.f32 %v326_v9 }
 0x1bf   : > { %v339_v16 = vor.u32 1.1754944e-38, %v338_v13  ;;  %vm337_vm13 = vcmp.eq.f32.partialorder %v336_v15, 8.507059e+37 }
 0x1c3   : > { %v578_v10 = vpop.eup %577 }
 0x1c4   : > { %v328_v11 = vmul.f32 %v578_v10, %v326_v9  ;;  %vm333_vm10 = vweird.f32 %v578_v10 }
 0x1c5   : > { %vm334_vm12 = vmor %vm332_vm11, %vm333_vm10 }
 0x1c6   : > { %v329_v12 = vsub.f32 1.0, %v328_v11 }
 0x1c8   : > { %v330_v14 = vmul.f32 %v578_v10, %v329_v12 }
 0x1ca   : > { %v331_v17 = vadd.f32 %v578_v10, %v330_v14 }
 0x1cc   : > { %v335_v18 = vsel %vm334_vm12, %v578_v10, %v331_v17 }
 0x1cd   : > { %v340_v19 = vsel %vm337_vm13, %v339_v16, %v335_v18 }
 0x1ce   : > { %v342_v20 = vperm.slane %v340_v19, 0 }
 0x1d0   : > { %359 = vperm.xlu1 %568, %v342_v20   ;;  %353 = vperm.xlu0 %567, %v342_v20  }
 0x1d1   : > { %347 = vperm.xlu2 %566, %v342_v20  }
 0x1d8   : > { %571 = vset.pattern.permute.xlu1 %v375_v21  ;;  %574 = vset.pattern.permute.xlu0 %v387_v23 }
 0x1d9   : > { %569 = vset.pattern.permute.xlu2 %v363_v22 }
 0x1e0   : > { %377 = vperm.xlu1 %571, %v342_v20  }
 0x1e1   : > { %365 = vperm.xlu2 %569, %v342_v20  }
 0x1e8   : > { %573 = vset.pattern.permute.xlu1 %v387_v23 }
 0x1e9   : > { %570 = vset.pattern.permute.xlu2 %v369_v24 }
 0x1f0   : > { %389 = vperm.xlu1 %573, %v342_v20  }
 0x1f1   : > { %371 = vperm.xlu2 %570, %v342_v20  }
 0x1f9   : > { %572 = vset.pattern.permute.xlu2 %v381_v25 }
 0x201   : > { %383 = vperm.xlu2 %572, %v342_v20  }
 0x22b   : > { %v348_v26 = vpop.permute.xlu2 %347 }
 0x22c   : > { %v391_v27 = vmul.f32 %v348_v26, %v797_v0 }
 0x22e   : > { %399 = vst [vmem:[%s190_s7] sm:$0xff] %v391_v27 }
 0x23b   : > { %v366_v28 = vpop.permute.xlu2 %365 }
 0x23c   : > { %v394_v29 = vmul.f32 %v366_v28, %v808_v4 }
 0x23e   : > { %402 = vst [vmem:[%s190_s7 + $0x18] sm:$0xff] %v394_v29 }
 0x242   : > { %v360_v30 = vpop.permute.xlu1 %359  ;;  %v354_v31 = vpop.permute.xlu0 %353 }
 0x243   : > { %v393_v32 = vmul.f32 %v360_v30, %v799_v1  ;;  %v392_v33 = vmul.f32 %v354_v31, %v806_v3 }
 0x245   : > { %401 = vst [vmem:[%s190_s7 + $0x10] sm:$0xff] %v393_v32 }
 0x246   : > { %400 = vst [vmem:[%s190_s7 + $0x8] sm:$0xff] %v392_v33 }
 0x24b   : > { %v372_v34 = vpop.permute.xlu2 %371 }
 0x24c   : > { %v395_v35 = vmul.f32 %v372_v34, %v801_v2 }
 0x24e   : > { %403 = vst [vmem:[%s190_s7 + $0x20] sm:$0xff] %v395_v35 }
 0x252   : > { %v378_v0 = vpop.permute.xlu1 %377 }
 0x253   : > { %v396_v36 = vmul.f32 %v378_v0, %v810_v5 }
 0x255   : > { %404 = vst [vmem:[%s190_s7 + $0x28] sm:$0xff] %v396_v36 }
 0x25b   : > { %v384_v4 = vpop.permute.xlu2 %383 }
 0x25c   : > { %v397_v37 = vmul.f32 %v384_v4, %v815_v6 }
 0x25e   : > { %405 = vst [vmem:[%s190_s7 + $0x30] sm:$0xff] %v397_v37 }
 0x262   : > { %v390_v1 = vpop.permute.xlu1 %389 }
 0x263   : > { %v398_v2 = vmul.f32 %v390_v1, %v817_v7 }
 0x265   : > { %406 = vst [vmem:[%s190_s7 + $0x38] sm:$0xff] %v398_v2 }
 0x266   : > { %636 = shalt.err (!%p633_p4)
}
 0x267   : > { %s679_s29 = smov 128   ;;  %s680_s6 = smov 8  }
 0x268   : > { %518 = dma.vmem_to_hbm [thread:$0]  (%p751_p11), %s421_s11, 1024, %s423_s17, %s408_s19, %s679_s29, %s679_s29, %s680_s6  }
 0x269 PF: > { %s437_s23 = sand.u32 1, %s663_s12   ;;  %p900_p7 = scmp.ge.s32.totalorder %s675_s15, 2 }
 0x26a   : > { %s438_s5 = scalar_lea.sflag [#allocation4], %s437_s23 }
 0x26b   : > { %p525_p5 = pnand %p900_p7, %p755_p12 }
 0x26d   : > { %p526_p8 = pneg %p525_p5 }
 0x26f   : > { %658 = dma.done.wait (%p526_p8), %s438_s5, 1024  }
 0x270   : > { %660 = vsyncadd (%p526_p8), %s438_s5, 4294966272  ;;  %p16_p10 = scmp.ge.s32.totalorder %s726_s18, 4   ;;  %s901_s12 = smov %s667_s13 }
 0x271   : > { %s902_s13 = smov %s671_s14  ;;  %s903_s14 = smov %s738_s21 }
 0x272   : > { %s904_s15 = smov %s726_s18  ;;  %18 = sbr.rel (!%p16_p10) target bundleno = 5 (0x5), region = 77 }
 0x277   :  { %444 = vsyncpa [#allocation3], 1 }
 0x278   :  { %446 = vsyncpa [#allocation3 + $0x1], 1 }
 0x279   :  { %447 = vsyncpa [#allocation4], 1 }
 0x27a   :  { %449 = vsyncpa [#allocation4 + $0x1], 1 }

</bundles_post_ra>
